<compile_context>
chip_gen: v5e
topology: v5e:2x2
jax: 0.10.0
libtpu: 0.0.40
codegen_flags: <defaults>
</compile_context>

<pallas_src>
import jax
import jax.numpy as jnp
from jax.experimental import pallas as pl
from jax.experimental.pallas import tpu as pltpu


# ---------------------------------------------------------------------------
# Kernel body
# ---------------------------------------------------------------------------
def _make_kernel(inv_hw, hw_total, hw_tile, lane_chunks, use_fold, needs_mask, shift_lanes):
    inv_shift = 1.0 / float(shift_lanes)

    def kernel(x_ref, std_ref, mean_ref, shift_sc, sum_sc, ssq_sc):
        t = pl.program_id(2)

        @pl.when(t == 0)
        def _init():
            sum_sc[...] = jnp.zeros_like(sum_sc)
            ssq_sc[...] = jnp.zeros_like(ssq_sc)
            # Cheap per-channel shift estimate from the first lanes of tile 0 (always valid
            # data: tile 0 is never a padded tail).  Any constant shift is exact algebraically;
            # a shift near the mean keeps E[x^2]-mean^2 well conditioned.
            x0 = x_ref[:, 0:shift_lanes].astype(jnp.float32)
            shift_sc[...] = jnp.sum(x0, axis=-1, keepdims=True) * inv_shift

        shift = shift_sc[...]                                   # (c_tile, 1)

        if use_fold:
            # Lane-wide accumulation: fold 128-lane chunks with VPU adds only; the single
            # cross-lane (XLU) reduce is deferred to the finalize step.
            c_tile = x_ref.shape[0]
            psum = jnp.zeros((c_tile, 128), jnp.float32)
            pssq = jnp.zeros((c_tile, 128), jnp.float32)
            for k in range(lane_chunks):
                xk = x_ref[:, k * 128:(k + 1) * 128].astype(jnp.float32) - shift
                if needs_mask:
                    lane = jax.lax.broadcasted_iota(jnp.int32, (c_tile, 128), 1)
                    valid = (t * hw_tile + k * 128 + lane) < hw_total
                    xk = jnp.where(valid, xk, 0.0)
                psum = psum + xk
                pssq = pssq + xk * xk
            sum_sc[...] += psum
            ssq_sc[...] += pssq
        else:
            x = x_ref[...].astype(jnp.float32) - shift          # (c_tile, hw_tile)
            if needs_mask:
                lane = jax.lax.broadcasted_iota(jnp.int32, x.shape, 1)
                valid = (t * hw_tile + lane) < hw_total
                x = jnp.where(valid, x, 0.0)
            sum_sc[...] += jnp.sum(x, axis=-1, keepdims=True)
            ssq_sc[...] += jnp.sum(x * x, axis=-1, keepdims=True)

        @pl.when(t == pl.num_programs(2) - 1)
        def _finalize():
            if use_fold:
                s = jnp.sum(sum_sc[...], axis=-1, keepdims=True)
                q = jnp.sum(ssq_sc[...], axis=-1, keepdims=True)
            else:
                s = sum_sc[...]
                q = ssq_sc[...]
            m_c = s * inv_hw                                    # E[x - shift]
            var = jnp.maximum(q * inv_hw - m_c * m_c, 0.0)
            std_ref[...] = jnp.sqrt(var).astype(std_ref.dtype)
            mean_ref[...] = (shift_sc[...] + m_c).astype(mean_ref.dtype)

    return kernel


# ---------------------------------------------------------------------------
# Hardware-aware sizing helpers
# ---------------------------------------------------------------------------
def _vmem_capacity_bytes():
    try:
        info = pltpu.get_tpu_info()
        cap = int(getattr(info, "vmem_capacity_bytes", 0))
        if cap > 0:
            return cap
    except Exception:
        pass
    return 64 << 20  # conservative default (v7x-sized) if the query is unavailable


def _tensorcores_per_chip():
    try:
        kind = jax.devices()[0].device_kind.lower()
    except Exception:
        return 1
    # v4 / v5p (megacore) and v7x expose 2 TensorCores per chip; v5e/v6e have 1.
    if any(tag in kind for tag in ("v4", "v5p", "v7", "7x")):
        return 2
    return 1


def _sublane_multiple(dtype):
    # Native sublane packing per dtype width: f32 -> 8, bf16 -> 16, int8/fp8 -> 32.
    return {4: 8, 2: 16, 1: 32}.get(jnp.dtype(dtype).itemsize, 8)


def _pick_c_tile(C, dtype, split_for_megacore):
    """Split C in half (to feed 2 TensorCores) only when requested and layout-clean."""
    if not split_for_megacore:
        return C
    m = _sublane_multiple(dtype)
    if C % (2 * m) == 0:
        return C // 2
    return C


def _pick_hw_tile(hw, c_tile, itemsize, buf_budget):
    """Pick the lane-tile size. Returns (hw_tile, needs_mask)."""
    max_lanes = max(128, buf_budget // max(1, c_tile * itemsize))
    if hw <= max_lanes:
        return hw, False                        # single full-extent tile (no mask needed)
    t = (max_lanes // 128) * 128
    # Prefer an exact multiple-of-128 divisor, but only if it stays near the budget
    # (a much smaller exact divisor would just multiply per-step overhead).
    d = t
    floor = max(128, (t * 3) // 4)
    while d >= floor:
        if hw % d == 0:
            return d, False
        d -= 128
    return t, True                              # tail tile masked in-kernel


# ---------------------------------------------------------------------------
# Public wrapper
# ---------------------------------------------------------------------------
def channel_descriptor(x_nchw, *, max_block_bytes=None):
    """Returns (std, mean), each (N, C, 1, 1), matching ChannelDescriptorLayer.forward."""
    N, C, H, W = x_nchw.shape
    HW = H * W
    x = x_nchw.reshape(N, C, HW)                # free view of NCHW; no transpose
    itemsize = x.dtype.itemsize

    vmem_cap = _vmem_capacity_bytes()
    tcs = _tensorcores_per_chip()

    # Headroom below physical/scoped VMEM for compiler + internal scratch.
    cap_limit = min(vmem_cap - (16 << 20), int(vmem_cap * 0.8))

    # Split C only when a second TensorCore exists and batch alone cannot feed it.
    split_c = (tcs >= 2) and (N == 1)
    c_tile = _pick_c_tile(C, x.dtype, split_c)
    n_c = C // c_tile

    # Scratch upper bound: shift (c,1) + two accumulators (c,128), all f32.
    scratch_bytes = c_tile * (1 + 2 * 128) * 4
    buf_count = 3                               # 3-deep input pipelining (pure streaming kernel)
    slack = 2 << 20
    per_gen_cap = (24 << 20) if vmem_cap > (96 << 20) else (14 << 20)
    buf_budget = max(1 << 20, (cap_limit - scratch_bytes - slack) // buf_count)
    buf_budget = min(buf_budget, per_gen_cap)
    if max_block_bytes is not None:             # test hook / manual override
        buf_budget = min(buf_budget, int(max_block_bytes))

    hw_tile, needs_mask = _pick_hw_tile(HW, c_tile, itemsize, buf_budget)
    n_hw = pl.cdiv(HW, hw_tile)

    lane_chunks = hw_tile // 128 if hw_tile % 128 == 0 else 0
    # Lane-wide fold only where the unroll and register footprint are clearly cheap;
    # for big tiles the single XLU reduce per tile is already noise under the DMA.
    use_fold = (2 <= lane_chunks <= 32) and (c_tile <= 64)
    shift_lanes = min(128, hw_tile)

    block_bytes = c_tile * hw_tile * itemsize
    total_steps = N * n_c * n_hw
    if total_steps < 3:
        buf_count = 2                           # nothing to pipeline beyond default
    vmem_limit = int(min(max(buf_count * block_bytes + scratch_bytes + slack, 8 << 20),
                         cap_limit))

    kernel = _make_kernel(1.0 / float(HW), HW, hw_tile, lane_chunks, use_fold,
                          needs_mask, shift_lanes)

    acc_shape = (c_tile, 128) if use_fold else (c_tile, 1)

    if buf_count > 2:
        in_spec = pl.BlockSpec((None, c_tile, hw_tile), lambda n, c, t: (n, c, t),
                               pipeline_mode=pl.Buffered(buf_count))
    else:
        in_spec = pl.BlockSpec((None, c_tile, hw_tile), lambda n, c, t: (n, c, t))

    cost = pl.CostEstimate(
        flops=3 * N * C * HW,
        transcendentals=0,
        bytes_accessed=N * C * HW * itemsize + 2 * N * C * itemsize,
    )

    std, mean = pl.pallas_call(
        kernel,
        out_shape=(
            jax.ShapeDtypeStruct((N, C, 1), x.dtype),
            jax.ShapeDtypeStruct((N, C, 1), x.dtype),
        ),
        grid_spec=pltpu.PrefetchScalarGridSpec(
            num_scalar_prefetch=0,
            grid=(N, n_c, n_hw),
            in_specs=[in_spec],
            out_specs=(
                pl.BlockSpec((None, c_tile, 1), lambda n, c, t: (n, c, 0)),
                pl.BlockSpec((None, c_tile, 1), lambda n, c, t: (n, c, 0)),
            ),
            scratch_shapes=[
                pltpu.VMEM((c_tile, 1), jnp.float32),   # per-channel shift
                pltpu.VMEM(acc_shape, jnp.float32),     # running Σ(x - shift)
                pltpu.VMEM(acc_shape, jnp.float32),     # running Σ(x - shift)^2
            ],
        ),
        compiler_params=pltpu.CompilerParams(
            dimension_semantics=("parallel", "parallel", "arbitrary"),
            vmem_limit_bytes=vmem_limit,
        ),
        cost_estimate=cost,
    )(x)

    return std.reshape(N, C, 1, 1), mean.reshape(N, C, 1, 1)


def channel_descriptor_ref(x):
    """Pure-JAX reference mirroring the PyTorch forward (two-pass variance)."""
    hw = x.shape[2] * x.shape[3]
    mean = jnp.sum(x, axis=(2, 3), keepdims=True) / hw
    var = jnp.sum((x - mean) ** 2, axis=(2, 3), keepdims=True) / hw
    return jnp.sqrt(var), mean


if __name__ == "__main__":
    key = jax.random.PRNGKey(0)

    # Base case (exercises the lane-folded accumulator path, single HW tile).
    N, C, H, W = 2, 4, 16, 16
    x = jax.random.normal(key, (N, C, H, W), dtype=jnp.float32)
    std, mean = channel_descriptor(x)
    std = jax.block_until_ready(std)
    mean = jax.block_until_ready(mean)
    std_ref, mean_ref = channel_descriptor_ref(x)
    assert std.shape == (N, C, 1, 1) and mean.shape == (N, C, 1, 1)
    assert std.dtype == x.dtype and mean.dtype == x.dtype
    assert jnp.allclose(mean, mean_ref, atol=2e-5, rtol=1e-5)
    assert jnp.allclose(std, std_ref, atol=2e-5, rtol=1e-5)

    # Offset data: the in-kernel per-channel shift keeps the one-pass variance accurate.
    x_off = x + 100.0
    std2, mean2 = channel_descriptor(x_off)
    jax.block_until_ready(mean2)
    std2_ref, mean2_ref = channel_descriptor_ref(x_off)
    assert jnp.allclose(mean2, mean2_ref, atol=1e-3, rtol=1e-5)
    assert jnp.allclose(std2, std2_ref, atol=1e-3, rtol=1e-4)

    # Small-spatial case (HW < 128): full-extent lane block, simple reduce path.
    x3 = jax.random.normal(jax.random.PRNGKey(1), (2, 8, 10, 10), dtype=jnp.float32)
    std3, mean3 = channel_descriptor(x3)
    jax.block_until_ready(mean3)
    std3_ref, mean3_ref = channel_descriptor_ref(x3)
    assert jnp.allclose(mean3, mean3_ref, atol=2e-5, rtol=1e-5)
    assert jnp.allclose(std3, std3_ref, atol=2e-5, rtol=1e-5)

    # Force the multi-tile + masked-tail path (HW=1000 has no multiple-of-128 divisor).
    x4 = jax.random.normal(jax.random.PRNGKey(2), (1, 4, 25, 40), dtype=jnp.float32)
    std4, mean4 = channel_descriptor(x4, max_block_bytes=4096)
    jax.block_until_ready(mean4)
    std4_ref, mean4_ref = channel_descriptor_ref(x4)
    assert jnp.allclose(mean4, mean4_ref, atol=2e-5, rtol=1e-5)
    assert jnp.allclose(std4, std4_ref, atol=2e-5, rtol=1e-5)

    print("KERNEL_OK")
</pallas_src>

<mosaic_0001>
module attributes {stable_mosaic.version = 11 : i64} {
  func.func @kernel(%arg0: i32, %arg1: i32, %arg2: i32, %arg3: memref<1x4x256xf32, #tpu.memory_space<vmem>>, %arg4: memref<1x4x1xf32, #tpu.memory_space<vmem>>, %arg5: memref<1x4x1xf32, #tpu.memory_space<vmem>>, %arg6: memref<4x1xf32, #tpu.memory_space<vmem>>, %arg7: memref<4x128xf32, #tpu.memory_space<vmem>>, %arg8: memref<4x128xf32, #tpu.memory_space<vmem>>) attributes {dimension_semantics = [#tpu.dimension_semantics<parallel>, #tpu.dimension_semantics<parallel>, #tpu.dimension_semantics<arbitrary>], iteration_bounds = array<i64: 2, 1, 1>, scalar_prefetch = 0 : i64, scratch_operands = 3 : i64, tpu.core_type = #tpu.core_type<tc>, window_params = [{transform_indices = @transform_0, window_bounds = array<i64: 1, 4, 256>}, {transform_indices = @transform_1, window_bounds = array<i64: 1, 4, 1>}, {transform_indices = @transform_2, window_bounds = array<i64: 1, 4, 1>}]} {
    %c0_i32 = arith.constant 0 : i32
    %0 = arith.cmpi eq, %arg2, %c0_i32 : i32
    %1 = arith.extui %0 : i1 to i32
    %c0_i32_0 = arith.constant 0 : i32
    %2 = arith.cmpi ne, %1, %c0_i32_0 : i32
    scf.if %2 {
      %cst_18 = arith.constant 0.000000e+00 : f32
      %29 = vector.broadcast %cst_18 : f32 to vector<4x128xf32>
      %c0_19 = arith.constant 0 : index
      %c0_20 = arith.constant 0 : index
      %30 = vector.load %arg7[%c0_19, %c0_20] : memref<4x128xf32, #tpu.memory_space<vmem>>, vector<4x128xf32>
      tpu.vector_store %arg7[%c0_19, %c0_20], %29 {strides = array<i32>} : memref<4x128xf32, #tpu.memory_space<vmem>>, vector<4x128xf32>,
      %cst_21 = arith.constant 0.000000e+00 : f32
      %31 = vector.broadcast %cst_21 : f32 to vector<4x128xf32>
      %c0_22 = arith.constant 0 : index
      %c0_23 = arith.constant 0 : index
      %32 = vector.load %arg8[%c0_22, %c0_23] : memref<4x128xf32, #tpu.memory_space<vmem>>, vector<4x128xf32>
      tpu.vector_store %arg8[%c0_22, %c0_23], %31 {strides = array<i32>} : memref<4x128xf32, #tpu.memory_space<vmem>>, vector<4x128xf32>,
      %c0_24 = arith.constant 0 : index
      %c0_25 = arith.constant 0 : index
      %c0_26 = arith.constant 0 : index
      %33 = vector.load %arg3[%c0_24, %c0_25, %c0_26] : memref<1x4x256xf32, #tpu.memory_space<vmem>>, vector<1x4x128xf32>
      %34 = vector.shape_cast %33 : vector<1x4x128xf32> to vector<4x128xf32>
      %cst_27 = arith.constant dense<0.000000e+00> : vector<4xf32>
      %35 = vector.multi_reduction <add>, %34, %cst_27 [1] : vector<4x128xf32> to vector<4xf32>
      %36 = vector.shape_cast %35 : vector<4xf32> to vector<4x1xf32>
      %cst_28 = arith.constant 7.812500e-03 : f32
      %37 = vector.broadcast %cst_28 : f32 to vector<4x1xf32>
      %38 = arith.mulf %36, %37 : vector<4x1xf32>
      %c0_29 = arith.constant 0 : index
      %c0_30 = arith.constant 0 : index
      %39 = vector.load %arg6[%c0_29, %c0_30] : memref<4x1xf32, #tpu.memory_space<vmem>>, vector<4x1xf32>
      tpu.vector_store %arg6[%c0_29, %c0_30], %38 {strides = array<i32>} : memref<4x1xf32, #tpu.memory_space<vmem>>, vector<4x1xf32>,
    } else {
    }
    %c0 = arith.constant 0 : index
    %c0_1 = arith.constant 0 : index
    %3 = vector.load %arg6[%c0, %c0_1] : memref<4x1xf32, #tpu.memory_space<vmem>>, vector<4x1xf32>
    %cst = arith.constant 0.000000e+00 : f32
    %4 = vector.broadcast %cst : f32 to vector<4x128xf32>
    %cst_2 = arith.constant 0.000000e+00 : f32
    %5 = vector.broadcast %cst_2 : f32 to vector<4x128xf32>
    %c0_3 = arith.constant 0 : index
    %c0_4 = arith.constant 0 : index
    %c0_5 = arith.constant 0 : index
    %6 = vector.load %arg3[%c0_3, %c0_4, %c0_5] : memref<1x4x256xf32, #tpu.memory_space<vmem>>, vector<1x4x128xf32>
    %7 = vector.shape_cast %6 : vector<1x4x128xf32> to vector<4x128xf32>
    %8 = vector.broadcast %3 : vector<4x1xf32> to vector<4x128xf32>
    %9 = arith.subf %7, %8 : vector<4x128xf32>
    %10 = arith.addf %4, %9 : vector<4x128xf32>
    %11 = arith.mulf %9, %9 : vector<4x128xf32>
    %12 = arith.addf %5, %11 : vector<4x128xf32>
    %c0_6 = arith.constant 0 : index
    %c0_7 = arith.constant 0 : index
    %c128 = arith.constant 128 : index
    %13 = vector.load %arg3[%c0_6, %c0_7, %c128] : memref<1x4x256xf32, #tpu.memory_space<vmem>>, vector<1x4x128xf32>
    %14 = vector.shape_cast %13 : vector<1x4x128xf32> to vector<4x128xf32>
    %15 = vector.broadcast %3 : vector<4x1xf32> to vector<4x128xf32>
    %16 = arith.subf %14, %15 : vector<4x128xf32>
    %17 = arith.addf %10, %16 : vector<4x128xf32>
    %18 = arith.mulf %16, %16 : vector<4x128xf32>
    %19 = arith.addf %12, %18 : vector<4x128xf32>
    %c0_8 = arith.constant 0 : index
    %c0_9 = arith.constant 0 : index
    %20 = vector.load %arg7[%c0_8, %c0_9] : memref<4x128xf32, #tpu.memory_space<vmem>>, vector<4x128xf32>
    %21 = arith.addf %20, %17 : vector<4x128xf32>
    %c0_10 = arith.constant 0 : index
    %c0_11 = arith.constant 0 : index
    %22 = vector.load %arg7[%c0_10, %c0_11] : memref<4x128xf32, #tpu.memory_space<vmem>>, vector<4x128xf32>
    tpu.vector_store %arg7[%c0_10, %c0_11], %21 {strides = array<i32>} : memref<4x128xf32, #tpu.memory_space<vmem>>, vector<4x128xf32>,
    %c0_12 = arith.constant 0 : index
    %c0_13 = arith.constant 0 : index
    %23 = vector.load %arg8[%c0_12, %c0_13] : memref<4x128xf32, #tpu.memory_space<vmem>>, vector<4x128xf32>
    %24 = arith.addf %23, %19 : vector<4x128xf32>
    %c0_14 = arith.constant 0 : index
    %c0_15 = arith.constant 0 : index
    %25 = vector.load %arg8[%c0_14, %c0_15] : memref<4x128xf32, #tpu.memory_space<vmem>>, vector<4x128xf32>
    tpu.vector_store %arg8[%c0_14, %c0_15], %24 {strides = array<i32>} : memref<4x128xf32, #tpu.memory_space<vmem>>, vector<4x128xf32>,
    %c0_i32_16 = arith.constant 0 : i32
    %26 = arith.cmpi eq, %arg2, %c0_i32_16 : i32
    %27 = arith.extui %26 : i1 to i32
    %c0_i32_17 = arith.constant 0 : i32
    %28 = arith.cmpi ne, %27, %c0_i32_17 : i32
    scf.if %28 {
      %c0_18 = arith.constant 0 : index
      %c0_19 = arith.constant 0 : index
      %29 = vector.load %arg7[%c0_18, %c0_19] : memref<4x128xf32, #tpu.memory_space<vmem>>, vector<4x128xf32>
      %cst_20 = arith.constant dense<0.000000e+00> : vector<4xf32>
      %30 = vector.multi_reduction <add>, %29, %cst_20 [1] : vector<4x128xf32> to vector<4xf32>
      %31 = vector.shape_cast %30 : vector<4xf32> to vector<4x1xf32>
      %c0_21 = arith.constant 0 : index
      %c0_22 = arith.constant 0 : index
      %32 = vector.load %arg8[%c0_21, %c0_22] : memref<4x128xf32, #tpu.memory_space<vmem>>, vector<4x128xf32>
      %cst_23 = arith.constant dense<0.000000e+00> : vector<4xf32>
      %33 = vector.multi_reduction <add>, %32, %cst_23 [1] : vector<4x128xf32> to vector<4xf32>
      %34 = vector.shape_cast %33 : vector<4xf32> to vector<4x1xf32>
      %cst_24 = arith.constant 3.906250e-03 : f32
      %35 = vector.broadcast %cst_24 : f32 to vector<4x1xf32>
      %36 = arith.mulf %31, %35 : vector<4x1xf32>
      %cst_25 = arith.constant 3.906250e-03 : f32
      %37 = vector.broadcast %cst_25 : f32 to vector<4x1xf32>
      %38 = arith.mulf %34, %37 : vector<4x1xf32>
      %39 = arith.mulf %36, %36 : vector<4x1xf32>
      %40 = arith.subf %38, %39 : vector<4x1xf32>
      %cst_26 = arith.constant 0.000000e+00 : f32
      %41 = vector.broadcast %cst_26 : f32 to vector<4x1xf32>
      %42 = arith.maximumf %40, %41 : vector<4x1xf32>
      %43 = math.sqrt %42 : vector<4x1xf32>
      %c0_27 = arith.constant 0 : index
      %c0_28 = arith.constant 0 : index
      %c0_29 = arith.constant 0 : index
      %44 = vector.load %arg4[%c0_27, %c0_28, %c0_29] : memref<1x4x1xf32, #tpu.memory_space<vmem>>, vector<1x4x1xf32>
      %45 = vector.shape_cast %44 : vector<1x4x1xf32> to vector<4x1xf32>
      %46 = vector.shape_cast %43 : vector<4x1xf32> to vector<1x4x1xf32>
      tpu.vector_store %arg4[%c0_27, %c0_28, %c0_29], %46 {strides = array<i32>} : memref<1x4x1xf32, #tpu.memory_space<vmem>>, vector<1x4x1xf32>,
      %c0_30 = arith.constant 0 : index
      %c0_31 = arith.constant 0 : index
      %47 = vector.load %arg6[%c0_30, %c0_31] : memref<4x1xf32, #tpu.memory_space<vmem>>, vector<4x1xf32>
      %48 = arith.addf %47, %36 : vector<4x1xf32>
      %c0_32 = arith.constant 0 : index
      %c0_33 = arith.constant 0 : index
      %c0_34 = arith.constant 0 : index
      %49 = vector.load %arg5[%c0_32, %c0_33, %c0_34] : memref<1x4x1xf32, #tpu.memory_space<vmem>>, vector<1x4x1xf32>
      %50 = vector.shape_cast %49 : vector<1x4x1xf32> to vector<4x1xf32>
      %51 = vector.shape_cast %48 : vector<4x1xf32> to vector<1x4x1xf32>
      tpu.vector_store %arg5[%c0_32, %c0_33, %c0_34], %51 {strides = array<i32>} : memref<1x4x1xf32, #tpu.memory_space<vmem>>, vector<1x4x1xf32>,
    } else {
    }
    return
  }
  func.func @transform_0(%arg0: i32, %arg1: i32, %arg2: i32) -> (i32, i32, i32) {
    %c0_i32 = arith.constant 0 : i32
    return %arg0, %arg1, %arg2 : i32, i32, i32
  }
  func.func @transform_1(%arg0: i32, %arg1: i32, %arg2: i32) -> (i32, i32, i32) {
    %c0_i32 = arith.constant 0 : i32
    %c0_i32_0 = arith.constant 0 : i32
    return %arg0, %arg1, %c0_i32 : i32, i32, i32
  }
  func.func @transform_2(%arg0: i32, %arg1: i32, %arg2: i32) -> (i32, i32, i32) {
    %c0_i32 = arith.constant 0 : i32
    %c0_i32_0 = arith.constant 0 : i32
    return %arg0, %arg1, %c0_i32 : i32, i32, i32
  }
}

</mosaic_0001>

<bundles_post_ra>
// kernel: tpu_custom_call.1
= control target key start
LH: loop header
LB: loop body
LE: loop exit
PB: predicated region body
PF: predicated region fallthrough
CT: control target
= control target key end

     0   :  { %8 = vsyncpa [#allocation6], 0  ;;  %s689_s0 = inlined_call_operand.hbm [shape: f32[2,4,256], index: 0, kind: input, shape index: {}]   ;;  %s690_s1 = inlined_call_operand.vmem [shape: f32[2,4,1], index: 1, kind: output, shape index: {0}]   ;;  %s691_s2 = inlined_call_operand.vmem [shape: f32[2,4,1], index: 2, kind: output, shape index: {1}]  }
   0x1   :  { %10 = vsyncpa [#allocation6 + $0x1], 0  ;;  %s592_s9 = smov 0   ;;  %s594_s10 = smov 0  }
   0x2   :  { %s596_s11 = smov 0   ;;  %s598_s12 = smov 0  }
   0x3   :  { %s600_s13 = smov 0   ;;  %s602_s14 = smov 0  }
   0x4 LB: > { %s419_s15 = sadd.s32 4294967295, %s573_s14   ;;  %s35_s16 = sadd.s32 1, %s569_s13  ;;  %s573_s14 = sphi %s602_s14, %s16_s14   ;;  %s569_s13 = sphi %s600_s13, %s698_s13   ;;  %s565_s12 = sphi %s598_s12, %s697_s12   ;;  %s561_s11 = sphi %s596_s11, %s696_s11   ;;  %s557_s10 = sphi %s594_s10, %s695_s10   ;;  %s553_s9 = sphi %s592_s9, %s694_s9  }
   0x5   : > { %p37_p0 = scmp.ge.s32.totalorder %s35_s16, 2  ;;  %s46_s17 = sadd.s32 1, %s561_s11 }
   0x6   : > { %p53_p1 = scmp.ne.s32.totalorder %s561_s11, %s557_s10  ;;  %p54_p2 = scmp.eq.s32.totalorder %s573_s14, 0 }
   0x7   : > { %s700_s16 = smov (%p37_p0, %s35_s16), 0  ;;  %p59_p4 = scmp.ne.s32.totalorder %s557_s10, %s553_s9 }
   0x8   : > { %p628_p3 = por %p54_p2, %p53_p1  ;;  %s39_s19 = ssub.s32 %s569_s13, %s700_s16 }
   0x9   : > { %p60_p5 = scmp.eq.s32.totalorder %s419_s15, 0  ;;  %p44_p6 = scmp.eq.s32.totalorder %s39_s19, 0 }
   0xa   : > { %p439_p8 = scmp.lt.s32.totalorder %s573_s14, 2  ;;  %s139_s22 = sand.u32 1, %s561_s11  }
   0xb   : > { %p635_p7 = por %p60_p5, %p59_p4  ;;  %s432_s23 = sshll.u32 %s569_s13, 3 }
   0xc   : > { %s641_s21 = scalar_select %p44_p6, %s561_s11, %s46_s17  }
   0xd   : > { %s423_s24 = sshll.u32 %s139_s22, 3  ;;  %s152_s27 = scalar_lea.hbm %s689_s0, %s432_s23 }
   0xe   : > { %s154_s28 = sshll.u32 %s152_s27, 4  ;;  %s143_s29 = scalar_lea.vmem [#allocation5], %s423_s24  ;;  %s155_s28 = int_to_ptr.hbm [resolvable:$true] %s154_s28 }
   0xf   : > { %s156_s30 = sshll.u32 %s143_s29, 4  ;;  %p436_p9 = pnand %p439_p8, %p628_p3  ;;  %s157_s30 = int_to_ptr.vmem [resolvable:$true] %s156_s30 }
  0x10   : > { %p426_p10 = scmp.ge.s32.totalorder %s573_s14, 1  ;;  %p161_p11 = scmp.lt.s32.totalorder %s573_s14, 3 }
  0x11   : > { %s140_s3 = scalar_lea.sflag [#allocation6], %s139_s22 }
  0x12   : > { %438 = dma.hbm_to_vmem [thread:$0]  (!%p436_p9), %s155_s28, 128, %s157_s30, %s140_s3  }
  0x13   : > { %p162_p12 = pnand %p426_p10, %p161_p11 }
  0x14   : > { %s167_s4 = sand.u32 (!%p162_p12), 1, %s557_s10  }
  0x15   : > { %165 = sbr.rel (%p162_p12) target bundleno = 437 (0x1b5), region = 24  ;;  %s427_s5 = sshll.u32 (!%p162_p12), %s167_s4, 3 }
  0x16   : > { %s168_s6 = scalar_lea.sflag (!%p162_p12), [#allocation6], %s167_s4  ;;  %s171_s7 = scalar_lea.vmem (!%p162_p12), [#allocation5], %s427_s5 }
  0x1a   : > { %548 = dma.done.wait (%p635_p7), %s168_s6, 128  }
  0x1b   : > { %550 = vsyncadd (%p635_p7), %s168_s6, 4294967168  ;;  %vm224_vm0 = vcmask 1043456   ;;  %v223_v0 = vld [vmem:[%s171_s7] sm:$0xf]  ;;  %v575_v2 = vmov 0   ;;  %v576_v3 = vmov 0.0  }
  0x1c   : > { %v225_v1 = vsel %vm224_vm0, %v223_v0, 0.0  ;;  %490 = vset.pattern.permute.xlu0 %v575_v2  ;;  %221 = vst [vmem:[#allocation3] sm:$0xf] %v576_v3  ;;  %vm229_vm1 = vcmask 3072   ;;  %v232_v7 = vld [vmem:[%s171_s7] sm:$0xf] }
  0x1d   : > { %226 = vadd.xlane.f32.xlu0 %v225_v1  ;;  %222 = vst [vmem:[#allocation4] sm:$0xf] %v576_v3  ;;  %v242_v8 = vld [vmem:[%s171_s7 + $0x4] sm:$0xf]  ;;  %p203_p13 = scmp.lt.s32.totalorder %s565_s12, 1 }
  0x1f   : > { %s702_s12 = smov (!%p203_p13, %s565_s12), 1 }
  0x20   : > { %s428_s8 = sshll.u32 %s702_s12, 2 }
  0x21   : > { %s216_s17 = scalar_lea.vmem %s691_s2, %s428_s8  ;;  %s209_s19 = scalar_lea.vmem %s690_s1, %s428_s8 }
  0x23   : > { %v247_v12 = vld [vmem:[#allocation3] sm:$0xf] }
  0x24   : > { %v250_v16 = vld [vmem:[#allocation4] sm:$0xf] }
  0x90   : > { %v227_v4 = vpop.xlane.xlu0 %226 }
  0x91   : > { %v228_v5 = vmul.f32 0.0078125, %v227_v4 }
  0x93   : > { %230 = vst.msk [vmem:[#allocation2] sm:$0xf] %vm229_vm1, %v228_v5 }
  0x9a   : > { %v231_v6 = vld [vmem:[#allocation2] sm:$0xf] }
  0x9b   : > { %235 = vperm.xlu0 %490, %v231_v6   ;;  %v284_v26 = vld [vmem:[#allocation2] sm:$0xf] }
 0x10d   : > { %v236_v9 = vpop.permute.xlu0 %235 }
 0x10e   : > { %v238_v10 = vsub.f32 %v232_v7, %v236_v9  ;;  %v243_v11 = vsub.f32 %v242_v8, %v236_v9 }
 0x110   : > { %v240_v13 = vmul.f32 %v238_v10, %v238_v10  ;;  %v244_v14 = vadd.f32 %v243_v11, %v238_v10  ;;  %v245_v15 = vmul.f32 %v243_v11, %v243_v11 }
 0x112   : > { %v246_v17 = vadd.f32 %v245_v15, %v240_v13  ;;  %v248_v18 = vadd.f32 %v247_v12, %v244_v14 }
 0x114   : > { %249 = vst [vmem:[#allocation3] sm:$0xf] %v248_v18  ;;  %v251_v19 = vadd.f32 %v250_v16, %v246_v17 }
 0x116   : > { %252 = vst [vmem:[#allocation4] sm:$0xf] %v251_v19 }
 0x11b   : > { %v256_v20 = vld [vmem:[#allocation3] sm:$0xf] }
 0x11c   : > { %v258_v21 = vsel %vm224_vm0, %v256_v20, 0.0 }
 0x11d   : > { %259 = vadd.xlane.f32.xlu1 %v258_v21  ;;  %v261_v22 = vld [vmem:[#allocation4] sm:$0xf] }
 0x11e   : > { %v262_v23 = vsel %vm224_vm0, %v261_v22, 0.0 }
 0x125   : > { %263 = vadd.xlane.f32.xlu1 %v262_v23 }
 0x190   : > { %v260_v24 = vpop.xlane.xlu1 %259 }
 0x191   : > { %v265_v25 = vmul.f32 0.00390625, %v260_v24 }
 0x193   : > { %v285_v27 = vadd.f32 %v284_v26, %v265_v25  ;;  %v267_v29 = vmul.f32 %v265_v25, %v265_v25 }
 0x195   : > { %286 = vst.msk [vmem:[%s216_s17] sm:$0xf] %vm229_vm1, %v285_v27 }
 0x198   : > { %v264_v28 = vpop.xlane.xlu1 %263 }
 0x199   : > { %v266_v30 = vmul.f32 0.00390625, %v264_v28 }
 0x19b   : > { %v268_v31 = vsub.f32 %v266_v30, %v267_v29 }
 0x19d   : > { %v269_v32 = vmax.f32 %v268_v31, 0.0 }
 0x19f   : > { %491 = vrsqrt.f32 %v269_v32  ;;  %vm277_vm2 = vcmp.eq.f32.partialorder %v269_v32, inf  ;;  %v280_v40 = vand.u32 2147483648, %v269_v32  ;;  %vm279_vm3 = vcmp.eq.f32.partialorder %v269_v32, 0.0 }
 0x1a5   : > { %v492_v33 = vpop.eup %491 }
 0x1a6   : > { %v271_v34 = vmul.f32 %v492_v33, %v269_v32 }
 0x1a8   : > { %v272_v35 = vmul.f32 %v492_v33, %v271_v34 }
 0x1aa   : > { %v273_v36 = vmul.f32 0.5, %v272_v35 }
 0x1ac   : > { %v274_v37 = vsub.f32 1.5, %v273_v36 }
 0x1ae   : > { %v275_v38 = vmul.f32 %v492_v33, %v274_v37 }
 0x1b0   : > { %v276_v39 = vmul.f32 %v275_v38, %v269_v32 }
 0x1b2   : > { %v278_v41 = vsel %vm277_vm2, %v269_v32, %v276_v39 }
 0x1b3   : > { %v281_v42 = vsel %vm279_vm3, %v280_v40, %v278_v41 }
 0x1b4   : > { %283 = vst.msk [vmem:[%s209_s19] sm:$0xf] %vm229_vm1, %v281_v42 }
 0x1b5 PF: > { %s16_s14 = sadd.s32 1, %s573_s14   ;;  %s694_s9 = smov %s557_s10 }
 0x1b6   : > { %p13_p0 = scmp.ge.s32.totalorder %s16_s14, 4   ;;  %s695_s10 = smov %s561_s11 }
 0x1b7   : > { %s696_s11 = smov %s641_s21  ;;  %s697_s12 = smov %s569_s13 }
 0x1b8   : > { %s698_s13 = smov %s700_s16  ;;  %15 = sbr.rel (!%p13_p0) target bundleno = 4 (0x4), region = 84 }
 0x1bd   :  { %332 = vsyncpa [#allocation6], 1 }
 0x1be   :  { %334 = vsyncpa [#allocation6 + $0x1], 1 }

</bundles_post_ra>
